<compile_context>
chip_gen: v5e
topology: v5e:2x2
jax: 0.10.0
libtpu: 0.0.40
codegen_flags: <defaults>
</compile_context>

<pallas_src>
import jax
import jax.numpy as jnp
from jax import lax
from jax.experimental import pallas as pl
from jax.experimental.pallas import tpu as pltpu


def attention_block_kernel(gamma_ref,     # SMEM (1,)            f32
                           x_res_ref,     # VMEM (1, C, TQ)      f32  residual tile
                           x_hbm_ref,     # ANY  (B, C, HW)      f32  projection source
                           wq_ref,        # VMEM (C8, C)         bf16
                           wk_ref,        # VMEM (C8, C)         bf16
                           wv_ref,        # VMEM (C, C)          bf16
                           bq_ref,        # VMEM (C8, 1)         f32
                           bk_ref,        # VMEM (C8, 1)         f32
                           bv_ref,        # VMEM (C, 1)          f32
                           o_ref,         # VMEM (1, C, TQ)      f32
                           q_scr,         # VMEM (C8, HW)        bf16
                           kt_scr,        # VMEM (HW, C8)        bf16  (k stored transposed)
                           v_scr,         # VMEM (C, HW)         bf16
                           xchunk,        # VMEM (C, CHUNK)      f32
                           dma_sem):      # DMA semaphore
    HW = v_scr.shape[1]
    CHUNK = xchunk.shape[1]
    TQ = o_ref.shape[2]
    b = pl.program_id(0)
    qi = pl.program_id(1)

    # ---- once per batch element: project q/k/v in HW chunks straight into scratch.
    @pl.when(qi == 0)
    def _project():
        def body(ci, carry):
            off = pl.multiple_of(ci * CHUNK, CHUNK)
            cp = pltpu.make_async_copy(
                x_hbm_ref.at[b, :, pl.ds(off, CHUNK)], xchunk, dma_sem)
            cp.start()
            cp.wait()
            x_bf = xchunk[...].astype(jnp.bfloat16)                  # (C, CHUNK)
            q_c = lax.dot_general(wq_ref[...], x_bf,
                                  (((1,), (0,)), ((), ())),
                                  preferred_element_type=jnp.float32) + bq_ref[...]
            k_c = lax.dot_general(wk_ref[...], x_bf,
                                  (((1,), (0,)), ((), ())),
                                  preferred_element_type=jnp.float32) + bk_ref[...]
            v_c = lax.dot_general(wv_ref[...], x_bf,
                                  (((1,), (0,)), ((), ())),
                                  preferred_element_type=jnp.float32) + bv_ref[...]
            q_scr[:, pl.ds(off, CHUNK)] = q_c.astype(jnp.bfloat16)
            # Store k transposed once per batch (small f32 transpose) so that every
            # attention tile's two big matmuls run with no per-step relayout.
            kt_scr[pl.ds(off, CHUNK), :] = jnp.transpose(k_c).astype(jnp.bfloat16)
            v_scr[:, pl.ds(off, CHUNK)] = v_c.astype(jnp.bfloat16)
            return carry
        lax.fori_loop(0, HW // CHUNK, body, 0)

    # ---- per query tile ----
    start = pl.multiple_of(qi * TQ, TQ)
    q_t = q_scr[:, pl.ds(start, TQ)]                                 # (C8, TQ) bf16

    # scores^T: att_t[j, i] = sum_c k[c, j] * q[c, i]   (natural MXU orientation)
    att_t = lax.dot_general(kt_scr[...], q_t,
                            (((1,), (0,)), ((), ())),
                            preferred_element_type=jnp.float32)      # (HW, TQ) f32

    # softmax over key positions (axis 0), un-normalized; normalization deferred to
    # the small (C, TQ) output (saves a full (HW, TQ) VPU/store pass).
    m = jnp.max(att_t, axis=0, keepdims=True)                        # (1, TQ)
    p = jnp.exp(att_t - m)                                           # (HW, TQ) f32
    l = jnp.sum(p, axis=0, keepdims=True)                            # (1, TQ)

    # out[c, i] = sum_j v[c, j] * p[j, i]   (natural MXU orientation, f32 accumulate)
    out_t = lax.dot_general(v_scr[...], p.astype(jnp.bfloat16),
                            (((1,), (0,)), ((), ())),
                            preferred_element_type=jnp.float32)      # (C, TQ) f32

    inv_l = pl.reciprocal(l, approx=False)                           # exact; only TQ elems
    x_t = x_res_ref[0]                                               # (C, TQ) f32 residual
    o_ref[0] = gamma_ref[0] * (out_t * inv_l) + x_t


def _vmem_budget_and_tq(HW):
    """Per-generation VMEM budget + query-tile choice (v7x has only 64 MiB/TC)."""
    vmem_cap = 128 * 1024 * 1024
    try:
        info = pltpu.get_tpu_info()
        vmem_cap = int(getattr(info, "vmem_capacity_bytes", vmem_cap))
    except Exception:
        pass
    # Leave headroom for compiler scratch & double-buffered blocks: ~48 MiB on v7x,
    # ~96 MiB on v5e/v6e.
    vmem_limit = min((vmem_cap * 3) // 4, 100 * 1024 * 1024)
    tq_candidates = (256, 128) if vmem_cap <= 64 * 1024 * 1024 else (512, 256, 128)
    tq = HW
    for cand in tq_candidates:
        if HW % cand == 0:
            tq = cand
            break
    return vmem_limit, tq


def attention_block(x_nchw, params, *, tq=None, proj_chunk=None):
    """x_nchw: (B, C, H, W) float32; params: dict of weights. Returns (B, C, H, W)."""
    B, C, H, W = x_nchw.shape
    assert C % 8 == 0, "channels must be divisible by 8 (channels//8 query/key dims)"
    HW = H * W
    C8 = C // 8

    # NCHW stays NCHW: just flatten spatial dims (no transpose / extra HBM pass).
    x = x_nchw.reshape(B, C, HW).astype(jnp.float32)

    wq = params["wq"].astype(jnp.bfloat16)
    wk = params["wk"].astype(jnp.bfloat16)
    wv = params["wv"].astype(jnp.bfloat16)
    bq = params["bq"].astype(jnp.float32).reshape(C8, 1)
    bk = params["bk"].astype(jnp.float32).reshape(C8, 1)
    bv = params["bv"].astype(jnp.float32).reshape(C, 1)
    gamma = params["gamma"].astype(jnp.float32).reshape(1)

    vmem_limit, tq_auto = _vmem_budget_and_tq(HW)
    if tq is None:
        tq = tq_auto
    assert HW % tq == 0, "query tile must divide H*W"
    nq = HW // tq

    if proj_chunk is None:
        proj_chunk = HW
        for cand in (512, 256, 128):
            if HW % cand == 0:
                proj_chunk = cand
                break
    assert HW % proj_chunk == 0, "projection chunk must divide H*W"

    # TODO(synk): for very large HW (>= ~8k) stream K/V tiles with an online softmax
    # instead of keeping the full-HW K/V slabs resident in VMEM.

    flops = B * (2 * HW * C * (2 * C8 + C)      # fused q/k/v projections
                 + 2 * HW * HW * C8             # scores
                 + 2 * HW * HW * C)             # p @ v
    bytes_accessed = int(2 * x.size * 4 + x.size * 4
                         + (wq.size + wk.size + wv.size) * 2
                         + (bq.size + bk.size + bv.size) * 4 + 4)
    cost = pl.CostEstimate(flops=flops,
                           transcendentals=B * HW * HW,
                           bytes_accessed=bytes_accessed)

    out = pl.pallas_call(
        attention_block_kernel,
        out_shape=jax.ShapeDtypeStruct((B, C, HW), jnp.float32),
        grid=(B, nq),
        in_specs=[
            pl.BlockSpec(memory_space=pltpu.SMEM),                 # gamma scalar
            pl.BlockSpec((1, C, tq), lambda b, q: (b, 0, q)),      # x residual tile
            pl.BlockSpec(memory_space=pl.ANY),                     # x in HBM (projection)
            pl.BlockSpec((C8, C), lambda b, q: (0, 0)),            # wq
            pl.BlockSpec((C8, C), lambda b, q: (0, 0)),            # wk
            pl.BlockSpec((C, C), lambda b, q: (0, 0)),             # wv
            pl.BlockSpec((C8, 1), lambda b, q: (0, 0)),            # bq
            pl.BlockSpec((C8, 1), lambda b, q: (0, 0)),            # bk
            pl.BlockSpec((C, 1), lambda b, q: (0, 0)),             # bv
        ],
        out_specs=pl.BlockSpec((1, C, tq), lambda b, q: (b, 0, q)),
        scratch_shapes=[
            pltpu.VMEM((C8, HW), jnp.bfloat16),                    # q slab
            pltpu.VMEM((HW, C8), jnp.bfloat16),                    # k slab (transposed)
            pltpu.VMEM((C, HW), jnp.bfloat16),                     # v slab
            pltpu.VMEM((C, proj_chunk), jnp.float32),              # x projection chunk
            pltpu.SemaphoreType.DMA(()),                           # projection DMA sem
        ],
        compiler_params=pltpu.CompilerParams(
            dimension_semantics=("parallel", "arbitrary"),
            vmem_limit_bytes=vmem_limit),
        cost_estimate=cost,
    )(gamma, x, x, wq, wk, wv, bq, bk, bv)

    return out.reshape(B, C, H, W)


def init_params(key, channels):
    """Parameter shapes follow the PyTorch module: Conv2d(Cin, Cout, 1).weight is
    (Cout, Cin, 1, 1) -> stored here as (Cout, Cin); gamma starts at 0."""
    C = channels
    C8 = C // 8
    ks = jax.random.split(key, 6)
    s = 1.0 / jnp.sqrt(C)
    return {
        "wq": jax.random.normal(ks[0], (C8, C), jnp.float32) * s,
        "bq": jax.random.normal(ks[1], (C8,), jnp.float32) * s,
        "wk": jax.random.normal(ks[2], (C8, C), jnp.float32) * s,
        "bk": jax.random.normal(ks[3], (C8,), jnp.float32) * s,
        "wv": jax.random.normal(ks[4], (C, C), jnp.float32) * s,
        "bv": jax.random.normal(ks[5], (C,), jnp.float32) * s,
        "gamma": jnp.zeros((1,), jnp.float32),
    }


def reference(x_nchw, params):
    """Pure-JAX f32 reference mirroring the PyTorch forward exactly."""
    B, C, H, W = x_nchw.shape
    HW = H * W
    xf = x_nchw.reshape(B, C, HW).astype(jnp.float32)
    q = jnp.einsum("oc,bcn->bon", params["wq"], xf) + params["bq"][None, :, None]
    k = jnp.einsum("oc,bcn->bon", params["wk"], xf) + params["bk"][None, :, None]
    v = jnp.einsum("oc,bcn->bon", params["wv"], xf) + params["bv"][None, :, None]
    att = jnp.einsum("bci,bcj->bij", q, k)          # q permuted to (HW, C8) . k
    att = jax.nn.softmax(att, axis=-1)
    out = jnp.einsum("bcj,bij->bci", v, att)        # bmm(v, att^T)
    res = params["gamma"][0] * out + xf
    return res.reshape(B, C, H, W)


if __name__ == "__main__":
    key = jax.random.PRNGKey(0)
    kx, kp = jax.random.split(key)

    B, C, H, W = 2, 64, 16, 16          # C//8 = 8, HW = 256
    x = jax.random.normal(kx, (B, C, H, W), jnp.float32)
    params = init_params(kp, C)
    params["gamma"] = jnp.array([0.5], jnp.float32)   # exercise the non-trivial path

    # tq=128 -> grid (2, 2); proj_chunk=128 -> 2 projection chunks (exercises the
    # chunked-DMA projection loop and the scratch reuse across query tiles).
    y = jax.block_until_ready(attention_block(x, params, tq=128, proj_chunk=128))

    y_ref = reference(x, params)
    assert y.shape == (B, C, H, W)
    # bf16 MXU operands (f32 accumulation / f32 softmax) => loosened tolerance vs
    # the pure-f32 reference.
    err = float(jnp.max(jnp.abs(y - y_ref)))
    assert jnp.allclose(y, y_ref, atol=5e-2, rtol=5e-2), f"mismatch vs reference: {err}"

    print("KERNEL_OK")
</pallas_src>

<mosaic_0001>
module attributes {stable_mosaic.version = 11 : i64} {
  func.func @attention_block_kernel(%arg0: i32, %arg1: i32, %arg2: memref<1xf32, #tpu.memory_space<smem>>, %arg3: memref<1x64x128xf32, #tpu.memory_space<vmem>>, %arg4: memref<2x64x256xf32, #tpu.memory_space<any>>, %arg5: memref<8x64xbf16, #tpu.memory_space<vmem>>, %arg6: memref<8x64xbf16, #tpu.memory_space<vmem>>, %arg7: memref<64x64xbf16, #tpu.memory_space<vmem>>, %arg8: memref<8x1xf32, #tpu.memory_space<vmem>>, %arg9: memref<8x1xf32, #tpu.memory_space<vmem>>, %arg10: memref<64x1xf32, #tpu.memory_space<vmem>>, %arg11: memref<1x64x128xf32, #tpu.memory_space<vmem>>, %arg12: memref<8x256xbf16, #tpu.memory_space<vmem>>, %arg13: memref<256x8xbf16, #tpu.memory_space<vmem>>, %arg14: memref<64x256xbf16, #tpu.memory_space<vmem>>, %arg15: memref<64x128xf32, #tpu.memory_space<vmem>>, %arg16: memref<!tpu.dma_semaphore, #tpu.memory_space<semaphore_mem>>) attributes {dimension_semantics = [#tpu.dimension_semantics<parallel>, #tpu.dimension_semantics<arbitrary>], iteration_bounds = array<i64: 2, 2>, scalar_prefetch = 0 : i64, scratch_operands = 5 : i64, tpu.core_type = #tpu.core_type<tc>, window_params = [{transform_indices = @transform_0, window_bounds = array<i64: 1>}, {transform_indices = @transform_1, window_bounds = array<i64: 1, 64, 128>}, {}, {pipeline_mode = #tpu.pipeline_mode<synchronous>, transform_indices = @transform_3, window_bounds = array<i64: 8, 64>}, {pipeline_mode = #tpu.pipeline_mode<synchronous>, transform_indices = @transform_4, window_bounds = array<i64: 8, 64>}, {pipeline_mode = #tpu.pipeline_mode<synchronous>, transform_indices = @transform_5, window_bounds = array<i64: 64, 64>}, {pipeline_mode = #tpu.pipeline_mode<synchronous>, transform_indices = @transform_6, window_bounds = array<i64: 8, 1>}, {pipeline_mode = #tpu.pipeline_mode<synchronous>, transform_indices = @transform_7, window_bounds = array<i64: 8, 1>}, {pipeline_mode = #tpu.pipeline_mode<synchronous>, transform_indices = @transform_8, window_bounds = array<i64: 64, 1>}, {transform_indices = @transform_9, window_bounds = array<i64: 1, 64, 128>}]} {
    %c0_i32 = arith.constant 0 : i32
    %0 = arith.cmpi eq, %arg1, %c0_i32 : i32
    %1 = arith.extui %0 : i1 to i32
    %c0_i32_0 = arith.constant 0 : i32
    %2 = arith.cmpi ne, %1, %c0_i32_0 : i32
    scf.if %2 {
      %c0_i32_15 = arith.constant 0 : i32
      %c2_i32 = arith.constant 2 : i32
      %31 = arith.addi %c0_i32_15, %c2_i32 : i32
      %c1_i32 = arith.constant 1 : i32
      scf.for %arg17 = %c0_i32_15 to %31 step %c1_i32  : i32 {
        %c128_i32_17 = arith.constant 128 : i32
        %32 = arith.muli %arg17, %c128_i32_17 : i32
        %33 = tpu.assume_multiple %32, 128 : i32
        %c0_i32_18 = arith.constant 0 : i32
        %34 = tpu.memref_slice %arg4[%arg0, %c0_i32_18, %33] : memref<2x64x256xf32, #tpu.memory_space<any>> -> memref<1x64x128xf32, #tpu.memory_space<any>>
        %35 = tpu.memref_squeeze %34 : memref<1x64x128xf32, #tpu.memory_space<any>> -> memref<64x128xf32, #tpu.memory_space<any>>
        tpu.enqueue_dma source(%35 : memref<64x128xf32, #tpu.memory_space<any>>) target(%arg15 : memref<64x128xf32, #tpu.memory_space<vmem>>) target_semaphore(%arg16 : memref<!tpu.dma_semaphore, #tpu.memory_space<semaphore_mem>>)
        %c0_i32_19 = arith.constant 0 : i32
        %36 = tpu.memref_slice %arg4[%arg0, %c0_i32_19, %33] : memref<2x64x256xf32, #tpu.memory_space<any>> -> memref<1x64x128xf32, #tpu.memory_space<any>>
        %37 = tpu.memref_squeeze %36 : memref<1x64x128xf32, #tpu.memory_space<any>> -> memref<64x128xf32, #tpu.memory_space<any>>
        tpu.wait_dma2 semaphore(%arg16 : memref<!tpu.dma_semaphore, #tpu.memory_space<semaphore_mem>>) src(%37 : memref<64x128xf32, #tpu.memory_space<any>>) dst(%arg15 : memref<64x128xf32, #tpu.memory_space<vmem>>)
        %c0_20 = arith.constant 0 : index
        %c0_21 = arith.constant 0 : index
        %38 = vector.load %arg15[%c0_20, %c0_21] : memref<64x128xf32, #tpu.memory_space<vmem>>, vector<64x128xf32>
        %39 = arith.truncf %38 : vector<64x128xf32> to vector<64x128xbf16>
        %c0_22 = arith.constant 0 : index
        %c0_23 = arith.constant 0 : index
        %40 = vector.load %arg5[%c0_22, %c0_23] : memref<8x64xbf16, #tpu.memory_space<vmem>>, vector<8x64xbf16>
        %cst_24 = arith.constant dense<0.000000e+00> : vector<8x128xf32>
        %41 = tpu.matmul %40, %39, %cst_24 {dimension_numbers = #tpu.dot_dimension_numbers<[1], [0], [0], [1], [0, 0, 1, 1], [], []>} : vector<8x64xbf16>, vector<64x128xbf16>, vector<8x128xf32> -> vector<8x128xf32>
        %c0_25 = arith.constant 0 : index
        %c0_26 = arith.constant 0 : index
        %42 = vector.load %arg8[%c0_25, %c0_26] : memref<8x1xf32, #tpu.memory_space<vmem>>, vector<8x1xf32>
        %43 = vector.broadcast %42 : vector<8x1xf32> to vector<8x128xf32>
        %44 = arith.addf %41, %43 : vector<8x128xf32>
        %c0_27 = arith.constant 0 : index
        %c0_28 = arith.constant 0 : index
        %45 = vector.load %arg6[%c0_27, %c0_28] : memref<8x64xbf16, #tpu.memory_space<vmem>>, vector<8x64xbf16>
        %cst_29 = arith.constant dense<0.000000e+00> : vector<8x128xf32>
        %46 = tpu.matmul %45, %39, %cst_29 {dimension_numbers = #tpu.dot_dimension_numbers<[1], [0], [0], [1], [0, 0, 1, 1], [], []>} : vector<8x64xbf16>, vector<64x128xbf16>, vector<8x128xf32> -> vector<8x128xf32>
        %c0_30 = arith.constant 0 : index
        %c0_31 = arith.constant 0 : index
        %47 = vector.load %arg9[%c0_30, %c0_31] : memref<8x1xf32, #tpu.memory_space<vmem>>, vector<8x1xf32>
        %48 = vector.broadcast %47 : vector<8x1xf32> to vector<8x128xf32>
        %49 = arith.addf %46, %48 : vector<8x128xf32>
        %c0_32 = arith.constant 0 : index
        %c0_33 = arith.constant 0 : index
        %50 = vector.load %arg7[%c0_32, %c0_33] : memref<64x64xbf16, #tpu.memory_space<vmem>>, vector<64x64xbf16>
        %cst_34 = arith.constant dense<0.000000e+00> : vector<64x128xf32>
        %51 = tpu.matmul %50, %39, %cst_34 {dimension_numbers = #tpu.dot_dimension_numbers<[1], [0], [0], [1], [0, 0, 1, 1], [], []>} : vector<64x64xbf16>, vector<64x128xbf16>, vector<64x128xf32> -> vector<64x128xf32>
        %c0_35 = arith.constant 0 : index
        %c0_36 = arith.constant 0 : index
        %52 = vector.load %arg10[%c0_35, %c0_36] : memref<64x1xf32, #tpu.memory_space<vmem>>, vector<64x1xf32>
        %53 = vector.broadcast %52 : vector<64x1xf32> to vector<64x128xf32>
        %54 = arith.addf %51, %53 : vector<64x128xf32>
        %55 = arith.truncf %44 : vector<8x128xf32> to vector<8x128xbf16>
        %c0_37 = arith.constant 0 : index
        %56 = arith.index_cast %33 : i32 to index
        %57 = vector.load %arg12[%c0_37, %56] : memref<8x256xbf16, #tpu.memory_space<vmem>>, vector<8x128xbf16>
        tpu.vector_store %arg12[%c0_37, %56], %55 {strides = array<i32>} : memref<8x256xbf16, #tpu.memory_space<vmem>>, vector<8x128xbf16>,
        %58 = tpu.transpose %49, [1, 0] : vector<8x128xf32> -> vector<128x8xf32>
        %59 = arith.truncf %58 : vector<128x8xf32> to vector<128x8xbf16>
        %60 = arith.index_cast %33 : i32 to index
        %c0_38 = arith.constant 0 : index
        %61 = vector.load %arg13[%60, %c0_38] : memref<256x8xbf16, #tpu.memory_space<vmem>>, vector<128x8xbf16>
        tpu.vector_store %arg13[%60, %c0_38], %59 {strides = array<i32>} : memref<256x8xbf16, #tpu.memory_space<vmem>>, vector<128x8xbf16>,
        %62 = arith.truncf %54 : vector<64x128xf32> to vector<64x128xbf16>
        %c0_39 = arith.constant 0 : index
        %63 = arith.index_cast %33 : i32 to index
        %64 = vector.load %arg14[%c0_39, %63] : memref<64x256xbf16, #tpu.memory_space<vmem>>, vector<64x128xbf16>
        tpu.vector_store %arg14[%c0_39, %63], %62 {strides = array<i32>} : memref<64x256xbf16, #tpu.memory_space<vmem>>, vector<64x128xbf16>,
      }
      %c2_i32_16 = arith.constant 2 : i32
    } else {
    }
    %c128_i32 = arith.constant 128 : i32
    %3 = arith.muli %arg1, %c128_i32 : i32
    %4 = tpu.assume_multiple %3, 128 : i32
    %c0 = arith.constant 0 : index
    %5 = arith.index_cast %4 : i32 to index
    %6 = vector.load %arg12[%c0, %5] : memref<8x256xbf16, #tpu.memory_space<vmem>>, vector<8x128xbf16>
    %c0_1 = arith.constant 0 : index
    %c0_2 = arith.constant 0 : index
    %7 = vector.load %arg13[%c0_1, %c0_2] : memref<256x8xbf16, #tpu.memory_space<vmem>>, vector<256x8xbf16>
    %cst = arith.constant dense<0.000000e+00> : vector<256x128xf32>
    %8 = tpu.matmul %7, %6, %cst {dimension_numbers = #tpu.dot_dimension_numbers<[1], [0], [0], [1], [0, 0, 1, 1], [], []>} : vector<256x8xbf16>, vector<8x128xbf16>, vector<256x128xf32> -> vector<256x128xf32>
    %cst_3 = arith.constant dense<0xFF800000> : vector<128xf32>
    %9 = vector.multi_reduction <maximumf>, %8, %cst_3 [0] : vector<256x128xf32> to vector<128xf32>
    %10 = vector.shape_cast %9 : vector<128xf32> to vector<1x128xf32>
    %11 = vector.broadcast %10 : vector<1x128xf32> to vector<256x128xf32>
    %12 = arith.subf %8, %11 : vector<256x128xf32>
    %13 = math.exp %12 : vector<256x128xf32>
    %cst_4 = arith.constant dense<0.000000e+00> : vector<128xf32>
    %14 = vector.multi_reduction <add>, %13, %cst_4 [0] : vector<256x128xf32> to vector<128xf32>
    %15 = vector.shape_cast %14 : vector<128xf32> to vector<1x128xf32>
    %c0_5 = arith.constant 0 : index
    %c0_6 = arith.constant 0 : index
    %16 = vector.load %arg14[%c0_5, %c0_6] : memref<64x256xbf16, #tpu.memory_space<vmem>>, vector<64x256xbf16>
    %17 = arith.truncf %13 : vector<256x128xf32> to vector<256x128xbf16>
    %cst_7 = arith.constant dense<0.000000e+00> : vector<64x128xf32>
    %18 = tpu.matmul %16, %17, %cst_7 {dimension_numbers = #tpu.dot_dimension_numbers<[1], [0], [0], [1], [0, 0, 1, 1], [], []>} : vector<64x256xbf16>, vector<256x128xbf16>, vector<64x128xf32> -> vector<64x128xf32>
    %19 = tpu.reciprocal %15 : vector<1x128xf32> -> vector<1x128xf32>
    %c0_8 = arith.constant 0 : index
    %c0_9 = arith.constant 0 : index
    %c0_10 = arith.constant 0 : index
    %20 = vector.load %arg3[%c0_8, %c0_9, %c0_10] : memref<1x64x128xf32, #tpu.memory_space<vmem>>, vector<1x64x128xf32>
    %21 = vector.shape_cast %20 : vector<1x64x128xf32> to vector<64x128xf32>
    %c0_11 = arith.constant 0 : index
    %22 = memref.load %arg2[%c0_11] : memref<1xf32, #tpu.memory_space<smem>>
    %23 = vector.broadcast %19 : vector<1x128xf32> to vector<64x128xf32>
    %24 = arith.mulf %18, %23 : vector<64x128xf32>
    %25 = vector.broadcast %22 : f32 to vector<64x128xf32>
    %26 = arith.mulf %25, %24 : vector<64x128xf32>
    %27 = arith.addf %26, %21 : vector<64x128xf32>
    %c0_12 = arith.constant 0 : index
    %c0_13 = arith.constant 0 : index
    %c0_14 = arith.constant 0 : index
    %28 = vector.load %arg11[%c0_12, %c0_13, %c0_14] : memref<1x64x128xf32, #tpu.memory_space<vmem>>, vector<1x64x128xf32>
    %29 = vector.shape_cast %28 : vector<1x64x128xf32> to vector<64x128xf32>
    %30 = vector.shape_cast %27 : vector<64x128xf32> to vector<1x64x128xf32>
    tpu.vector_store %arg11[%c0_12, %c0_13, %c0_14], %30 {strides = array<i32>} : memref<1x64x128xf32, #tpu.memory_space<vmem>>, vector<1x64x128xf32>,
    return
  }
  func.func @transform_0(%arg0: i32, %arg1: i32) -> i32 {
    %c0_i32 = arith.constant 0 : i32
    %c0_i32_0 = arith.constant 0 : i32
    return %c0_i32 : i32
  }
  func.func @transform_1(%arg0: i32, %arg1: i32) -> (i32, i32, i32) {
    %c0_i32 = arith.constant 0 : i32
    %c0_i32_0 = arith.constant 0 : i32
    return %arg0, %c0_i32, %arg1 : i32, i32, i32
  }
  func.func @transform_3(%arg0: i32, %arg1: i32) -> (i32, i32) {
    %c0_i32 = arith.constant 0 : i32
    %c0_i32_0 = arith.constant 0 : i32
    %c0_i32_1 = arith.constant 0 : i32
    return %c0_i32, %c0_i32_0 : i32, i32
  }
  func.func @transform_4(%arg0: i32, %arg1: i32) -> (i32, i32) {
    %c0_i32 = arith.constant 0 : i32
    %c0_i32_0 = arith.constant 0 : i32
    %c0_i32_1 = arith.constant 0 : i32
    return %c0_i32, %c0_i32_0 : i32, i32
  }
  func.func @transform_5(%arg0: i32, %arg1: i32) -> (i32, i32) {
    %c0_i32 = arith.constant 0 : i32
    %c0_i32_0 = arith.constant 0 : i32
    %c0_i32_1 = arith.constant 0 : i32
    return %c0_i32, %c0_i32_0 : i32, i32
  }
  func.func @transform_6(%arg0: i32, %arg1: i32) -> (i32, i32) {
    %c0_i32 = arith.constant 0 : i32
    %c0_i32_0 = arith.constant 0 : i32
    %c0_i32_1 = arith.constant 0 : i32
    return %c0_i32, %c0_i32_0 : i32, i32
  }
  func.func @transform_7(%arg0: i32, %arg1: i32) -> (i32, i32) {
    %c0_i32 = arith.constant 0 : i32
    %c0_i32_0 = arith.constant 0 : i32
    %c0_i32_1 = arith.constant 0 : i32
    return %c0_i32, %c0_i32_0 : i32, i32
  }
  func.func @transform_8(%arg0: i32, %arg1: i32) -> (i32, i32) {
    %c0_i32 = arith.constant 0 : i32
    %c0_i32_0 = arith.constant 0 : i32
    %c0_i32_1 = arith.constant 0 : i32
    return %c0_i32, %c0_i32_0 : i32, i32
  }
  func.func @transform_9(%arg0: i32, %arg1: i32) -> (i32, i32, i32) {
    %c0_i32 = arith.constant 0 : i32
    %c0_i32_0 = arith.constant 0 : i32
    return %arg0, %c0_i32, %arg1 : i32, i32, i32
  }
}

</mosaic_0001>

<bundles_post_ra>
// kernel: tpu_custom_call.1
= control target key start
LH: loop header
LB: loop body
LE: loop exit
PB: predicated region body
PF: predicated region fallthrough
CT: control target
= control target key end

     0   :  { %s2517_s0 = inlined_call_operand.<no memory space> [shape: f32[1], index: 0, kind: input, shape index: {}]   ;;  %s2518_s1 = inlined_call_operand.hbm [shape: f32[2,64,256], index: 1, kind: input, shape index: {}]   ;;  %s2519_s2 = inlined_call_operand.hbm [shape: f32[2,64,256], index: 2, kind: input, shape index: {}]   ;;  %s2520_s3 = inlined_call_operand.vmem [shape: bf16[8,64], index: 3, kind: input, shape index: {}]   ;;  %s2521_s4 = inlined_call_operand.vmem [shape: bf16[8,64], index: 4, kind: input, shape index: {}]   ;;  %s2522_s5 = inlined_call_operand.vmem [shape: bf16[64,64], index: 5, kind: input, shape index: {}]   ;;  %s2523_s6 = inlined_call_operand.vmem [shape: f32[8,1], index: 6, kind: input, shape index: {}]   ;;  %s2524_s7 = inlined_call_operand.vmem [shape: f32[8,1], index: 7, kind: input, shape index: {}]   ;;  %s2525_s8 = inlined_call_operand.vmem [shape: f32[64,1], index: 8, kind: input, shape index: {}]   ;;  %s2526_s9 = inlined_call_operand.hbm [shape: f32[2,64,256], index: 9, kind: output, shape index: {}]  }
   0x1   :  { %2538 = sst [smem:[#allocation25_spill]] %s2518_s1 }
   0x2   :  { %2539 = sst [smem:[#allocation26_spill]] %s2526_s9 }
   0x3   :  { %14 = sst [smem:[#allocation7]] %s2517_s0 }
   0x4   :  { %15 = vsyncpa [#allocation9], 0 }
   0x5   :  { %17 = vsyncpa [#allocation9 + $0x1], 0 }
   0x6   :  { %18 = vsyncpa [#allocation10], 0 }
   0x7   :  { %20 = vsyncpa [#allocation10 + $0x1], 0  ;;  %s1966_s11 = smov 0   ;;  %s1968_s12 = smov 0  }
   0x8   :  { %s1970_s13 = smov 0   ;;  %s1972_s14 = smov 0  }
   0x9   :  { %s1974_s15 = smov 0   ;;  %s1976_s16 = smov 0  }
   0xa   :  { %s1978_s17 = smov 0   ;;  %s1980_s18 = smov 0  }
   0xb LB: > { %2540 = sst [smem:[#allocation16_spill]] %s1868_s11  ;;  %s1378_s0 = sadd.s32 4294967295, %s1896_s18   ;;  %s1896_s18 = sphi %s1980_s18, %s26_s18   ;;  %s1892_s17 = sphi %s1978_s17, %s2565_s17   ;;  %s1888_s16 = sphi %s1976_s16, %s2564_s16   ;;  %s1884_s15 = sphi %s1974_s15, %s2563_s15   ;;  %s1880_s14 = sphi %s1972_s14, %s2562_s14   ;;  %s1876_s13 = sphi %s1970_s13, %s2561_s13   ;;  %s1872_s12 = sphi %s1968_s12, %s2567_s12   ;;  %s1868_s11 = sphi %s1966_s11, %s2566_s11  }
   0xc   : > { %2541 = sst [smem:[#allocation17_spill]] %s1876_s13  ;;  %s1379_s19 = sadd.s32 4294967294, %s1896_s18  }
   0xd   : > { %2542 = sst [smem:[#allocation18_spill]] %s1888_s16  ;;  %s35_s20 = sadd.s32 1, %s1888_s16 }
   0xe   : > { %2543 = sst [smem:[#allocation19_spill]] %s1892_s17  ;;  %s38_s21 = sadd.s32 1, %s1892_s17 }
   0xf   : > { %p36_p0 = scmp.ge.s32.totalorder %s35_s20, 2  ;;  %s68_s22 = sadd.s32 1, %s1876_s13 }
  0x10   : > { %p75_p1 = scmp.ne.s32.totalorder %s1876_s13, %s1872_s12  ;;  %p76_p2 = scmp.eq.s32.totalorder %s1896_s18, 0 }
  0x11   : > { %s2569_s20 = smov (%p36_p0, %s35_s20), 0  ;;  %s2571_s21 = smov (!%p36_p0, %s38_s21), %s1892_s17 }
  0x12   : > { %2544 = sst [smem:[#allocation20_spill]] %s2569_s20  ;;  %s64_s23 = ssub.s32 %s1888_s16, %s2569_s20 }
  0x13   : > { %p2019_p3 = por %p76_p2, %p75_p1  ;;  %p40_p4 = scmp.ge.s32.totalorder %s2571_s21, 2 }
  0x14   : > { %p81_p5 = scmp.ne.s32.totalorder %s1872_s12, %s1868_s11  ;;  %p82_p6 = scmp.eq.s32.totalorder %s1378_s0, 0 }
  0x15   : > { %p233_p7 = scmp.eq.s32.totalorder %s1378_s0, 3  ;;  %s2573_s21 = smov (%p40_p4, %s2571_s21), 0 }
  0x16   : > { %2546 = sst [smem:[#allocation21_spill]] %s2573_s21  ;;  %p2027_p8 = por %p82_p6, %p81_p5 }
  0x17   : > { %p2031_p9 = por %p233_p7, %p75_p1  ;;  %s63_s27 = ssub.s32 %s1892_s17, %s2573_s21 }
  0x18   : > { %p239_p10 = scmp.eq.s32.totalorder %s1379_s19, 3  ;;  %s65_s28 = sor.u32 %s64_s23, %s63_s27 }
  0x19   : > { %s2548_s26 = scalar_select %p2031_p9, 1, 0 }
  0x1a   : > { %p66_p11 = scmp.eq.s32.totalorder %s65_s28, 0  ;;  %p2037_p12 = por %p239_p10, %p81_p5 }
  0x1b   : > { %2549 = sst [smem:[#allocation22_spill]] %s2548_s26  ;;  %p1583_p13 = scmp.lt.s32.totalorder %s1896_s18, 4 }
  0x1c   : > { %s2550_s29 = scalar_select %p2037_p12, 1, 0 }
  0x1d   : > { %s280_s30 = sand.u32 1, %s1876_s13   ;;  %s1383_s20 = sshll.u32 %s1892_s17, 4 }
  0x1e   : > { %2551 = sst [smem:[#allocation23_spill]] %s2550_s29  ;;  %s1382_s0 = sshll.u32 %s280_s30, 6 }
  0x1f   : > { %s2044_s10 = scalar_select %p66_p11, %s1876_s13, %s68_s22  }
  0x20   : > { %s288_s11 = sadd.s32 %s1888_s16, %s1383_s20  ;;  %s284_s9 = scalar_lea.vmem [#allocation8], %s1382_s0 }
  0x21   : > { %2552 = sst [smem:[#allocation24_spill]] %s2044_s10  ;;  %s293_s26 = sshll.u32 %s284_s9, 4  ;;  %s294_s26 = int_to_ptr.vmem [resolvable:$true] %s293_s26 }
  0x22   : > { %s1384_s21 = sshll.u32 %s288_s11, 3  ;;  %s2553_s1 = sld [smem:[#allocation25_spill]] }
  0x23   : > { %p1576_p0 = pnand %p1583_p13, %p2019_p3  ;;  %s281_s29 = scalar_lea.sflag [#allocation9], %s280_s30 }
  0x24   : > { %s1902_s22 = smov 256   ;;  %s1903_s10 = smov 128  }
  0x25   : > { %s1904_s13 = smov 8   ;;  %p1385_p1 = scmp.ge.s32.totalorder %s1896_s18, 1 }
  0x26   : > { %p301_p2 = scmp.lt.s32.totalorder %s1896_s18, 5 }
  0x28   : > { %s290_s27 = scalar_lea.hbm %s2553_s1, %s1384_s21  ;;  %p302_p4 = pnand %p1385_p1, %p301_p2 }
  0x29   : > { %s291_s28 = sshll.u32 %s290_s27, 4  ;;  %s2056_s9 = sand.u32 (!%p302_p4), 1, %s1872_s12   ;;  %s292_s28 = int_to_ptr.hbm [resolvable:$true] %s291_s28 }
  0x2a   : > { %1578 = dma.hbm_to_vmem [thread:$0]  (!%p1576_p0), %s292_s28, 1024, %s294_s26, %s281_s29, %s1902_s22, %s1903_s10, %s1904_s13  }
  0x2b   : > { %305 = sbr.rel (%p302_p4) target bundleno = 1085 (0x43d), region = 52  ;;  %s1386_s11 = sshll.u32 (!%p302_p4), %s2056_s9, 6 }
  0x2c   : > { %s308_s20 = scalar_lea.sflag (!%p302_p4), [#allocation9], %s2056_s9  ;;  %s2060_s21 = scalar_lea.vmem (!%p302_p4), [#allocation8], %s1386_s11 }
  0x30   : > { %1857 = dma.done.wait (%p2027_p8), %s308_s20, 1024  }
  0x31   : > { %1859 = vsyncadd (%p2027_p8), %s308_s20, 4294966272  ;;  %s2066_s13 = scalar_lea.vmem [#allocation11], %s1386_s11  ;;  %p1388_p3 = scmp.ne.s32.totalorder %s1880_s14, 0 }
  0x32   : > { %s2069_s24 = smov (!%p1388_p3), 0  }
  0x33   : > { %349 = sbr.rel (%p1388_p3) target bundleno = 552 (0x228), region = 60 }
  0x38 LB: >> { %s1390_s26 = sshll.u32 %s1884_s15, 4  ;;  %s2536_s29 = sshll.u32 %s1900_s24, 7  ;;  %s1900_s24 = sphi %s2069_s24, %s355_s24  }
  0x39   : >> { %s1905_s30 = smov [#allocation5]   ;;  %s2078_s10 = sshra.s32 %s2536_s29, 7 }
  0x3a   : >> { %s365_s25 = sshll.u32 %s1905_s30, 4  ;;  %s360_s0 = sadd.s32 %s1390_s26, %s2078_s10  ;;  %s366_s25 = int_to_ptr.vmem [resolvable:$true] %s365_s25 }
  0x3b   : >> { %s1391_s19 = sshll.u32 %s360_s0, 3  ;;  %s1772_s30 = scalar_lea.hbm %s2519_s2, 256 }
  0x3c   : >> { %s362_s28 = scalar_lea.hbm %s2519_s2, %s1391_s19 }
  0x3d   : >> { %s363_s22 = sshll.u32 %s362_s28, 4  ;;  %s364_s22 = int_to_ptr.hbm [resolvable:$true] %s363_s22 }
  0x3e   : >> { %s1768_s11 = sshra.s32 %s364_s22, 4  ;;  %s1769_s11 = int_to_ptr.hbm [resolvable:$true] %s1768_s11 }
  0x3f   : >> { %s1770_s20 = scalar_lea.hbm %s1769_s11, 64  ;;  %p1773_p6 = scmp.lt.s32.totalorder %s1769_s11, %s2519_s2 }
  0x40   : >> { %p1771_p5 = scmp.ne.s32.totalorder %s1769_s11, %s1770_s20  ;;  %p1774_p7 = scmp.lt.s32.totalorder %s1772_s30, %s1770_s20 }
  0x42   : >> { %p1775_p8 = por %p1774_p7, %p1773_p6 }
  0x44   : >> { %p1776_p10 = pnand %p1775_p8, %p1771_p5 }
  0x46   : >> { %1779 = shalt.err (!%p1776_p10)  }
  0x47   : >> { %s1906_s26 = smov 256   ;;  %s1907_s0 = smov 128  }
  0x48   : >> { %s1908_s19 = smov 8  }
  0x49   : >> { %370 = dma.hbm_to_vmem [thread:$0]  %s364_s22, 1024, %s366_s25, [#allocation6], %s1906_s26, %s1907_s0, %s1908_s19 }
  0x4a   : >> { %1860 = dma.done.wait [#allocation6], 1024 }
  0x4b   : >> { %1861 = vsyncadd [#allocation6], 4294966272  ;;  %v1909_v0 = vmov 0   ;;  %v412_v1 = vld [vmem:[%s2524_s7] sm:$0xff]  ;;  %v381_v2 = vld [vmem:[#allocation5 + $0x30] sm:$0xff]  ;;  %vm394_vm0 = vcmask 523264  }
  0x4c   : >> { %1669 = vset.pattern.permute.xlu0 %v1909_v0  ;;  %1671 = vset.pattern.permute.xlu2 %v1909_v0  ;;  %v382_v3 = vld [vmem:[#allocation5 + $0x38] sm:$0xff]  ;;  %v379_v5 = vld [vmem:[#allocation5 + $0x20] sm:$0xff]  ;;  %v380_v6 = vld [vmem:[#allocation5 + $0x28] sm:$0xff]  ;;  %s1414_s28 = sshll.u32 %s2078_s10, 2  ;;  %s2554_s16 = sshll.u32 %s1900_s24, 7  ;;  %vm607_vm1 = vcmask 60416  }
  0x4d   : >> { %415 = vperm.xlu0 %1669, %v412_v1   ;;  %v386_v4 = vpack.c.bf16 %v382_v3, %v381_v2  ;;  %v385_v7 = vpack.c.bf16 %v380_v6, %v379_v5  ;;  %v377_v8 = vld [vmem:[#allocation5 + $0x10] sm:$0xff]  ;;  %v378_v9 = vld [vmem:[#allocation5 + $0x18] sm:$0xff]  ;;  %v375_v12 = vld [vmem:[#allocation5] sm:$0xff]  ;;  %s553_s22 = scalar_lea.vmem [#allocation2], %s1414_s28  ;;  %s2142_s26 = scalar_lea.vmem [#allocation4], %s1414_s28 }
  0x4e   : >> { %v388_v10 = vld [vmem:[%s2523_s6] sm:$0xff]  ;;  %v384_v11 = vpack.c.bf16 %v378_v9, %v377_v8  ;;  %v376_v13 = vld [vmem:[#allocation5 + $0x8] sm:$0xff]  ;;  %v445_v15 = vld [vmem:[%s2525_s8 + $0x18] sm:$0xff]  ;;  %s603_s29 = sshra.s32 %s2554_s16, 3  ;;  %s355_s24 = sadd.s32 1, %s1900_s24  }
  0x4f   : >> { %402 = vmatpush.bf16.msra.mxu0 %v386_v4  ;;  %425 = vmatpush.bf16.msra.mxu1 %v386_v4  ;;  %v383_v14 = vpack.c.bf16 %v376_v13, %v375_v12  ;;  %v387_v16 = vld [vmem:[%s2520_s3] sm:$0xf]  ;;  %v1539_v19 = vld [vmem:[%s2522_s5 + $0x10] sm:$0xff]  ;;  %v447_v20 = vld [vmem:[%s2525_s8 + $0x28] sm:$0xff]  ;;  %s1415_s25 = sshll.u32 %s603_s29, 2  ;;  %p352_p11 = scmp.ge.s32.totalorder %s355_s24, 2  }
  0x50   : >> { %526 = vmatpush.bf16.msra.mxu2 %v386_v4  ;;  %1565 = vmatpush.bf16.msra.mxu3 %v386_v4  ;;  %v411_v17 = vld [vmem:[%s2521_s4] sm:$0xf]  ;;  %v449_v21 = vld [vmem:[%s2525_s8 + $0x38] sm:$0xff]  ;;  %v1538_v22 = vld [vmem:[%s2522_s5 + $0x8] sm:$0xff]  ;;  %s2156_s23 = scalar_lea.vmem [#allocation3], %s1415_s25 }
  0x51   : >> { %v1537_v18 = vld [vmem:[%s2522_s5] sm:$0xff]  ;;  %v1540_v23 = vld [vmem:[%s2522_s5 + $0x18] sm:$0xff]  ;;  %v443_v32 = vld [vmem:[%s2525_s8 + $0x8] sm:$0xff] }
  0x52   : >> { %457 = vperm.xlu2 %1671, %v443_v32   ;;  %v444_v37 = vld [vmem:[%s2525_s8 + $0x10] sm:$0xff]  ;;  %v446_v52 = vld [vmem:[%s2525_s8 + $0x20] sm:$0xff] }
  0x53   : >> { %403 = vmatpush.bf16.msra.mxu0 %v385_v7  ;;  %426 = vmatpush.bf16.msra.mxu1 %v385_v7  ;;  %v448_v53 = vld [vmem:[%s2525_s8 + $0x30] sm:$0xff]  ;;  %v442_v2 = vld [vmem:[%s2525_s8] sm:$0xff] }
  0x54   : >> { %527 = vmatpush.bf16.msra.mxu2 %v385_v7  ;;  %1566 = vmatpush.bf16.msra.mxu3 %v385_v7 }
  0x55   : >> { %391 = vperm.xlu0 %1669, %v388_v10  }
  0x57   : >> { %404 = vmatpush.bf16.msra.mxu0 %v384_v11  ;;  %427 = vmatpush.bf16.msra.mxu1 %v384_v11 }
  0x58   : >> { %528 = vmatpush.bf16.msra.mxu2 %v384_v11  ;;  %1567 = vmatpush.bf16.msra.mxu3 %v384_v11 }
  0x5a   : >> { %462 = vperm.xlu2 %1671, %v444_v37  }
  0x5b   : >> { %405 = vmatpush.bf16.msra.mxu0 %v383_v14  ;;  %428 = vmatpush.bf16.msra.mxu1 %v383_v14 }
  0x5c   : >> { %529 = vmatpush.bf16.msra.mxu2 %v383_v14  ;;  %1568 = vmatpush.bf16.msra.mxu3 %v383_v14 }
  0x5d   : >> { %467 = vperm.xlu0 %1669, %v445_v15  }
  0x5e   : >> { %1392 = vmatmul.msk.bf16.vlgmr.msra.gmra.mxu0 %vm394_vm0, %v387_v16  ;;  %1393 = vmatmul.msk.bf16.vlgmr.msra.gmra.mxu1 %vm394_vm0, %v411_v17 }
  0x5f   : >> { %1410 = vmatmul.msk.bf16.vlgmr.msra.gmra.mxu2 %vm394_vm0, %v1537_v18  ;;  %1412 = vmatmul.msk.bf16.vlgmr.msra.gmra.mxu3 %vm394_vm0, %v1539_v19 }
  0x62   : >> { %472 = vperm.xlu2 %1671, %v446_v52  }
  0x65   : >> { %477 = vperm.xlu0 %1669, %v447_v20  }
  0x6a   : >> { %482 = vperm.xlu2 %1671, %v448_v53  }
  0x6d   : >> { %487 = vperm.xlu0 %1669, %v449_v21  }
  0x6f   : >> { %1411 = vmatmul.msk.bf16.gmra.mxu2 %vm394_vm0, %v1538_v22  ;;  %1413 = vmatmul.msk.bf16.gmra.mxu3 %vm394_vm0, %v1540_v23 }
  0xac   : >> { %v458_v3 = vpop.permute.xlu2 %457 }
  0xb4   : >> { %v463_v8 = vpop.permute.xlu2 %462 }
  0xbc   : >> { %v473_v13 = vpop.permute.xlu2 %472 }
  0xbf   : >> { %v416_v24 = vpop.permute.xlu0 %415 }
  0xc4   : >> { %v483_v18 = vpop.permute.xlu2 %482 }
  0xc7   : >> { %v392_v25 = vpop.permute.xlu0 %391 }
  0xcf   : >> { %v468_v31 = vpop.permute.xlu0 %467 }
  0xd7   : >> { %v478_v38 = vpop.permute.xlu0 %477 }
  0xdb   : >> { %v407_v26 = vpop.f32.mrf.mxu0  ;;  %v430_v27 = vpop.f32.mrf.mxu1 }
  0xdc   : >> { %v408_v28 = vadd.f32 %v407_v26, %v392_v25  ;;  %v431_v29 = vadd.f32 %v430_v27, %v416_v24 }
  0xde   : >> { %v551_v30 = vpack.c.bf16 %v408_v28, %v408_v28  ;;  %555 = vxpose.xlu1.b32.start.end [1/1] (short) %v431_v29, 128 }
  0xdf   : >> { %v488_v45 = vpop.permute.xlu0 %487 }
  0xe0   : >> { %554 = vst [vmem:[%s553_s22] sm:$0xf] %v551_v30 }
  0xe2   : >> { %v2135_v33 = vpop.f32.mrf.mxu2  ;;  %v2137_v34 = vpop.f32.mrf.mxu3 }
  0xe3   : >> { %v432_v35 = vpop.f32.mrf.mxu1  ;;  %v409_v36 = vpop.f32.mrf.mxu0  ;;  %v542_v14 = vadd.f32 %v2137_v34, %v473_v13 }
  0xe5   : >> { %v628_v17 = vpack.c.bf16 %v542_v14, %v542_v14 }
  0xe7   : >> { %638 = vst [vmem:[%s2142_s26 + $0x20] sm:$0xf] %v628_v17 }
  0xea   : >> { %v533_v39 = vpop.f32.mrf.mxu2  ;;  %v543_v40 = vpop.f32.mrf.mxu3 }
  0xeb   : >> { %v544_v41 = vadd.f32 %v543_v40, %v478_v38  ;;  %v534_v4 = vadd.f32 %v533_v39, %v458_v3 }
  0xed   : >> { %v629_v42 = vpack.c.bf16 %v544_v41, %v544_v41  ;;  %v625_v5 = vpack.c.bf16 %v534_v4, %v534_v4 }
  0xef   : >> { %639 = vst [vmem:[%s2142_s26 + $0x28] sm:$0xf] %v629_v42 }
  0xf0   : >> { %635 = vst [vmem:[%s2142_s26 + $0x8] sm:$0xf] %v625_v5 }
  0xf2   : >> { %v536_v43 = vpop.f32.mrf.mxu2  ;;  %v546_v44 = vpop.f32.mrf.mxu3 }
  0xf3   : >> { %v537_v9 = vadd.f32 %v536_v43, %v463_v8  ;;  %v547_v19 = vadd.f32 %v546_v44, %v483_v18 }
  0xf5   : >> { %v626_v10 = vpack.c.bf16 %v537_v9, %v537_v9  ;;  %v630_v22 = vpack.c.bf16 %v547_v19, %v547_v19 }
  0xf7   : >> { %636 = vst [vmem:[%s2142_s26 + $0x10] sm:$0xf] %v626_v10 }
  0xf8   : >> { %640 = vst [vmem:[%s2142_s26 + $0x30] sm:$0xf] %v630_v22 }
  0xfa   : >> { %v538_v46 = vpop.f32.mrf.mxu2  ;;  %v548_v47 = vpop.f32.mrf.mxu3 }
  0xfb   : >> { %v539_v48 = vadd.f32 %v538_v46, %v468_v31  ;;  %v549_v49 = vadd.f32 %v548_v47, %v488_v45 }
  0xfd   : >> { %v627_v50 = vpack.c.bf16 %v539_v48, %v539_v48  ;;  %v631_v51 = vpack.c.bf16 %v549_v49, %v549_v49 }
  0xff   : >> { %637 = vst [vmem:[%s2142_s26 + $0x18] sm:$0xf] %v627_v50 }
 0x100   : >> { %641 = vst [vmem:[%s2142_s26 + $0x38] sm:$0xf] %v631_v51 }
 0x131   : >> { %1670 = vset.pattern.permute.xlu1 %v1909_v0 }
 0x182   : >> { %v571_v54 = vpop.trf.xlu1 }
 0x183   : >> { %v587_v55 = vpack.c.bf16 %v571_v54, %v571_v54 }
 0x185   : >> { %608 = vst.msk [vmem:[%s2156_s23] sm:$0xf] %vm607_vm1, %v587_v55 }
 0x18a   : >> { %v572_v56 = vpop.trf.xlu1 }
 0x18b   : >> { %v588_v57 = vpack.c.bf16 %v572_v56, %v572_v56 }
 0x18d   : >> { %609 = vst.msk [vmem:[%s2156_s23 + $0x4] sm:$0xf] %vm607_vm1, %v588_v57 }
 0x192   : >> { %v573_v58 = vpop.trf.xlu1 }
 0x193   : >> { %v589_v59 = vpack.c.bf16 %v573_v58, %v573_v58 }
 0x195   : >> { %610 = vst.msk [vmem:[%s2156_s23 + $0x8] sm:$0xf] %vm607_vm1, %v589_v59 }
 0x19a   : >> { %v574_v60 = vpop.trf.xlu1 }
 0x19b   : >> { %v590_v61 = vpack.c.bf16 %v574_v60, %v574_v60 }
 0x19d   : >> { %611 = vst.msk [vmem:[%s2156_s23 + $0xc] sm:$0xf] %vm607_vm1, %v590_v61 }
 0x1a2   : >> { %v575_v62 = vpop.trf.xlu1 }
 0x1a3   : >> { %v591_v63 = vpack.c.bf16 %v575_v62, %v575_v62 }
 0x1a5   : >> { %612 = vst.msk [vmem:[%s2156_s23 + $0x10] sm:$0xf] %vm607_vm1, %v591_v63 }
 0x1aa   : >> { %v576_v0 = vpop.trf.xlu1 }
 0x1ab   : >> { %v592_v1 = vpack.c.bf16 %v576_v0, %v576_v0 }
 0x1ad   : >> { %613 = vst.msk [vmem:[%s2156_s23 + $0x14] sm:$0xf] %vm607_vm1, %v592_v1 }
 0x1b0   : >> { %452 = vperm.xlu1 %1670, %v442_v2  }
 0x1b2   : >> { %v577_v6 = vpop.trf.xlu1 }
 0x1b3   : >> { %v593_v7 = vpack.c.bf16 %v577_v6, %v577_v6 }
 0x1b5   : >> { %614 = vst.msk [vmem:[%s2156_s23 + $0x18] sm:$0xf] %vm607_vm1, %v593_v7 }
 0x1ba   : >> { %v578_v11 = vpop.trf.xlu1 }
 0x1bb   : >> { %v594_v12 = vpack.c.bf16 %v578_v11, %v578_v11 }
 0x1bd   : >> { %615 = vst.msk [vmem:[%s2156_s23 + $0x1c] sm:$0xf] %vm607_vm1, %v594_v12 }
 0x1c2   : >> { %v579_v15 = vpop.trf.xlu1 }
 0x1c3   : >> { %v595_v16 = vpack.c.bf16 %v579_v15, %v579_v15 }
 0x1c5   : >> { %616 = vst.msk [vmem:[%s2156_s23 + $0x20] sm:$0xf] %vm607_vm1, %v595_v16 }
 0x1ca   : >> { %v580_v20 = vpop.trf.xlu1 }
 0x1cb   : >> { %v596_v21 = vpack.c.bf16 %v580_v20, %v580_v20 }
 0x1cd   : >> { %617 = vst.msk [vmem:[%s2156_s23 + $0x24] sm:$0xf] %vm607_vm1, %v596_v21 }
 0x1d2   : >> { %v581_v23 = vpop.trf.xlu1 }
 0x1d3   : >> { %v597_v24 = vpack.c.bf16 %v581_v23, %v581_v23 }
 0x1d5   : >> { %618 = vst.msk [vmem:[%s2156_s23 + $0x28] sm:$0xf] %vm607_vm1, %v597_v24 }
 0x1da   : >> { %v582_v25 = vpop.trf.xlu1 }
 0x1db   : >> { %v598_v26 = vpack.c.bf16 %v582_v25, %v582_v25 }
 0x1dd   : >> { %619 = vst.msk [vmem:[%s2156_s23 + $0x2c] sm:$0xf] %vm607_vm1, %v598_v26 }
 0x1e2   : >> { %v583_v27 = vpop.trf.xlu1 }
 0x1e3   : >> { %v599_v28 = vpack.c.bf16 %v583_v27, %v583_v27 }
 0x1e5   : >> { %620 = vst.msk [vmem:[%s2156_s23 + $0x30] sm:$0xf] %vm607_vm1, %v599_v28 }
 0x1ea   : >> { %v584_v29 = vpop.trf.xlu1 }
 0x1eb   : >> { %v600_v30 = vpack.c.bf16 %v584_v29, %v584_v29 }
 0x1ed   : >> { %621 = vst.msk [vmem:[%s2156_s23 + $0x34] sm:$0xf] %vm607_vm1, %v600_v30 }
 0x1f2   : >> { %v585_v31 = vpop.trf.xlu1 }
 0x1f3   : >> { %v601_v32 = vpack.c.bf16 %v585_v31, %v585_v31 }
 0x1f5   : >> { %622 = vst.msk [vmem:[%s2156_s23 + $0x38] sm:$0xf] %vm607_vm1, %v601_v32 }
 0x1fa   : >> { %v586_v34 = vpop.trf.xlu1 }
 0x1fb   : >> { %v602_v35 = vpack.c.bf16 %v586_v34, %v586_v34 }
 0x1fd   : >> { %623 = vst.msk [vmem:[%s2156_s23 + $0x3c] sm:$0xf] %vm607_vm1, %v602_v35 }
 0x222   : >> { %v453_v36 = vpop.permute.xlu1 %452 }
 0x223   : >> { %v532_v37 = vadd.f32 %v2135_v33, %v453_v36  ;;  %354 = sbr.rel (!%p352_p11) target bundleno = 56 (0x38), region = 113 }
 0x225   : >> { %v624_v38 = vpack.c.bf16 %v532_v37, %v532_v37 }
 0x227   : >> { %634 = vst [vmem:[%s2142_s26] sm:$0xf] %v624_v38 }
 0x228 PF: > { %s1417_s22 = sshll.u32 %s1880_s14, 7  ;;  %vm809_vm2 = vcmask 1043456   ;;  %v1541_v41 = vld [vmem:[#allocation3] sm:$0xff]  ;;  %v1550_v42 = vld [vmem:[#allocation3 + $0x48] sm:$0xff]  ;;  %vm760_vm3 = vcmask 64512   ;;  %v1551_v43 = vld [vmem:[#allocation3 + $0x50] sm:$0xff] }
 0x229   : > { %s643_s11 = sshra.s32 %s1417_s22, 7  ;;  %v1542_v33 = vld [vmem:[#allocation3 + $0x8] sm:$0xff]  ;;  %v1543_v44 = vld [vmem:[#allocation3 + $0x10] sm:$0xff]  ;;  %v1552_v45 = vld [vmem:[#allocation3 + $0x58] sm:$0xff]  ;;  %s1216_s24 = sld [smem:[#allocation7]] }
 0x22a   : > { %s1418_s20 = sshll.u32 %s643_s11, 2  ;;  %v1548_v46 = vld [vmem:[#allocation3 + $0x38] sm:$0xff]  ;;  %v1553_v48 = vld [vmem:[#allocation3 + $0x60] sm:$0xff]  ;;  %v1554_v51 = vld [vmem:[#allocation3 + $0x68] sm:$0xff]  ;;  %s1532_s30 = sshll.u32 %s1884_s15, 4 }
 0x22b   : > { %s646_s10 = scalar_lea.vmem [#allocation2], %s1418_s20  ;;  %v1544_v47 = vld [vmem:[#allocation3 + $0x18] sm:$0xff]  ;;  %v1549_v49 = vld [vmem:[#allocation3 + $0x40] sm:$0xff]  ;;  %v1546_v52 = vld [vmem:[#allocation3 + $0x28] sm:$0xff]  ;;  %s1261_s26 = sadd.s32 %s1880_s14, %s1532_s30 }
 0x22c   : > { %v647_v39 = vld [vmem:[%s646_s10] sm:$0xf]  ;;  %v1545_v50 = vld [vmem:[#allocation3 + $0x20] sm:$0xff]  ;;  %v1555_v53 = vld [vmem:[#allocation3 + $0x70] sm:$0xff]  ;;  %s1533_s0 = sshll.u32 %s1261_s26, 3  ;;  %s2555_s17 = sld [smem:[#allocation26_spill]] }
 0x22d   : > { %v811_v40 = vsel %vm809_vm2, %v647_v39, 0  ;;  %v1547_v54 = vld [vmem:[#allocation3 + $0x30] sm:$0xff]  ;;  %v1556_v55 = vld [vmem:[#allocation3 + $0x78] sm:$0xff]  ;;  %s1264_s25 = sshll.u32 %s2066_s13, 4  ;;  %s1251_s23 = scalar_lea.sflag [#allocation10], %s2056_s9  ;;  %s1265_s25 = int_to_ptr.vmem [resolvable:$true] %s1264_s25 }
 0x22e   : > { %820 = vmatpush.bf16.msra.mxu0 %v811_v40  ;;  %1570 = vmatpush.bf16.msra.mxu3 %v811_v40 }
 0x22f   : > { %1569 = vmatpush.bf16.msra.mxu1 %v811_v40 }
 0x231   : > { %1483 = vmatmul.msk.bf16.vlgmr.msra.gmra.mxu0 %vm760_vm3, %v1541_v41  ;;  %1492 = vmatmul.msk.bf16.vlgmr.msra.gmra.mxu3 %vm760_vm3, %v1550_v42 }
 0x232   : > { %1490 = vmatmul.msk.bf16.vlgmr.msra.gmra.mxu1 %vm760_vm3, %v1548_v46  ;;  %s2556_s29 = smov %s2555_s17  ;;  %s1263_s16 = scalar_lea.hbm %s2555_s17, %s1533_s0 }
 0x233   : > { %s1266_s14 = sshll.u32 %s1263_s16, 4  ;;  %s1812_s20 = scalar_lea.hbm %s2556_s29, 256  ;;  %s1267_s14 = int_to_ptr.hbm [resolvable:$true] %s1266_s14 }
 0x234   : > { %s1806_s27 = sshra.s32 %s1267_s14, 4  ;;  %s1807_s27 = int_to_ptr.hbm [resolvable:$true] %s1806_s27 }
 0x235   : > { %s1808_s28 = scalar_lea.hbm %s1807_s27, 64  ;;  %p1813_p2 = scmp.lt.s32.totalorder %s1807_s27, %s2556_s29 }
 0x236   : > { %p1809_p13 = scmp.ne.s32.totalorder %s1807_s27, %s1808_s28  ;;  %p1814_p4 = scmp.lt.s32.totalorder %s1812_s20, %s1808_s28 }
 0x238   : > { %p1810_p0 = pnand %p1809_p13, %p2031_p9  ;;  %p1815_p3 = por %p1814_p4, %p1813_p2 }
 0x23a   : > { %p1811_p1 = pneg %p1810_p0 }
 0x23c   : > { %p1816_p5 = pnand %p1815_p3, %p1811_p1 }
 0x241   : > { %1484 = vmatmul.msk.bf16.gmra.mxu0 %vm760_vm3, %v1542_v33  ;;  %1493 = vmatmul.msk.bf16.gmra.mxu3 %vm760_vm3, %v1551_v43 }
 0x242   : > { %1491 = vmatmul.msk.bf16.gmra.mxu1 %vm760_vm3, %v1549_v49 }
 0x251   : > { %1485 = vmatmul.msk.bf16.gmra.mxu0 %vm760_vm3, %v1543_v44  ;;  %1494 = vmatmul.msk.bf16.gmra.mxu3 %vm760_vm3, %v1552_v45 }
 0x261   : > { %1486 = vmatmul.msk.bf16.gmra.mxu0 %vm760_vm3, %v1544_v47  ;;  %1495 = vmatmul.msk.bf16.gmra.mxu3 %vm760_vm3, %v1553_v48 }
 0x271   : > { %1487 = vmatmul.msk.bf16.gmra.mxu0 %vm760_vm3, %v1545_v50  ;;  %1496 = vmatmul.msk.bf16.gmra.mxu3 %vm760_vm3, %v1554_v51 }
 0x281   : > { %1488 = vmatmul.msk.bf16.gmra.mxu0 %vm760_vm3, %v1546_v52  ;;  %1497 = vmatmul.msk.bf16.gmra.mxu3 %vm760_vm3, %v1555_v53 }
 0x291   : > { %1489 = vmatmul.msk.bf16.gmra.mxu0 %vm760_vm3, %v1547_v54  ;;  %1498 = vmatmul.msk.bf16.gmra.mxu3 %vm760_vm3, %v1556_v55 }
 0x2ae   : > { %v2220_v56 = vpop.f32.mrf.mxu0 }
 0x2af   : > { %v2258_v11 = vpop.f32.mrf.mxu1 }
 0x2b4   : > { %v2222_v57 = vpop.f32.mrf.mxu3 }
 0x2b6   : > { %v2224_v58 = vpop.f32.mrf.mxu0 }
 0x2b7   : > { %v2264_v14 = vpop.f32.mrf.mxu1 }
 0x2bc   : > { %v2226_v59 = vpop.f32.mrf.mxu3 }
 0x2be   : > { %v2228_v60 = vpop.f32.mrf.mxu0 }
 0x2bf   : > { %v2281_v24 = vpop.f32.mrf.mxu1 }
 0x2c4   : > { %v2230_v61 = vpop.f32.mrf.mxu3 }
 0x2c6   : > { %v2232_v62 = vpop.f32.mrf.mxu0 }
 0x2c7   : > { %v2301_v40 = vpop.f32.mrf.mxu1 }
 0x2cc   : > { %v2234_v63 = vpop.f32.mrf.mxu3 }
 0x2ce   : > { %v2236_v0 = vpop.f32.mrf.mxu0 }
 0x2cf   : > { %v902_v18 = vmax.f32 %v2220_v56, %v2236_v0 }
 0x2d4   : > { %v2238_v1 = vpop.f32.mrf.mxu3 }
 0x2d6   : > { %v2240_v2 = vpop.f32.mrf.mxu0 }
 0x2d7   : > { %v903_v29 = vmax.f32 %v2224_v58, %v2240_v2 }
 0x2dc   : > { %v2242_v3 = vpop.f32.mrf.mxu3 }
 0x2de   : > { %v2244_v4 = vpop.f32.mrf.mxu0 }
 0x2df   : > { %v904_v19 = vmax.f32 %v2228_v60, %v2244_v4 }
 0x2e4   : > { %v2246_v5 = vpop.f32.mrf.mxu3 }
 0x2e6   : > { %v2248_v6 = vpop.f32.mrf.mxu0 }
 0x2e7   : > { %v905_v17 = vmax.f32 %v2232_v62, %v2248_v6 }
 0x2ec   : > { %v2250_v7 = vpop.f32.mrf.mxu3 }
 0x2ee   : > { %v2252_v8 = vpop.f32.mrf.mxu0 }
 0x2ef   : > { %v906_v22 = vmax.f32 %v902_v18, %v2252_v8 }
 0x2f4   : > { %v2254_v9 = vpop.f32.mrf.mxu3 }
 0x2f6   : > { %v2256_v10 = vpop.f32.mrf.mxu0 }
 0x2f7   : > { %v907_v34 = vmax.f32 %v903_v29, %v2256_v10 }
 0x2fc   : > { %v2260_v12 = vpop.f32.mrf.mxu3 }
 0x2fe   : > { %v2262_v13 = vpop.f32.mrf.mxu0 }
 0x2ff   : > { %v908_v23 = vmax.f32 %v904_v19, %v2262_v13 }
 0x301   : > { %v912_v28 = vmax.f32 %v908_v23, %v2258_v11 }
 0x303   : > { %v916_v35 = vmax.f32 %v912_v28, %v2222_v57 }
 0x304   : > { %v2266_v15 = vpop.f32.mrf.mxu3 }
 0x305   : > { %v920_v41 = vmax.f32 %v916_v35, %v2238_v1 }
 0x306   : > { %v2268_v16 = vpop.f32.mrf.mxu0 }
 0x307   : > { %v909_v20 = vmax.f32 %v905_v17, %v2268_v16  ;;  %v924_v46 = vmax.f32 %v920_v41, %v2254_v9 }
 0x309   : > { %v913_v26 = vmax.f32 %v909_v20, %v2264_v14 }
 0x30b   : > { %v917_v30 = vmax.f32 %v913_v26, %v2226_v59 }
 0x30c   : > { %v2277_v21 = vpop.f32.mrf.mxu3 }
 0x30d   : > { %v921_v39 = vmax.f32 %v917_v30, %v2242_v3 }
 0x30e   : > { %v2283_v25 = vpop.f32.mrf.mxu0 }
 0x30f   : > { %v910_v27 = vmax.f32 %v906_v22, %v2283_v25  ;;  %v925_v44 = vmax.f32 %v921_v39, %v2260_v12 }
 0x311   : > { %v914_v31 = vmax.f32 %v910_v27, %v2281_v24 }
 0x313   : > { %v918_v37 = vmax.f32 %v914_v31, %v2230_v61 }
 0x314   : > { %v2292_v32 = vpop.f32.mrf.mxu3 }
 0x315   : > { %v922_v33 = vmax.f32 %v918_v37, %v2246_v5  ;;  %v928_v49 = vmax.f32 %v924_v46, %v2292_v32 }
 0x316   : > { %v2296_v36 = vpop.f32.mrf.mxu0 }
 0x317   : > { %v911_v38 = vmax.f32 %v907_v34, %v2296_v36  ;;  %v926_v50 = vmax.f32 %v922_v33, %v2266_v15 }
 0x319   : > { %v915_v42 = vmax.f32 %v911_v38, %v2301_v40 }
 0x31b   : > { %v919_v43 = vmax.f32 %v915_v42, %v2234_v63 }
 0x31c   : > { %v2308_v45 = vpop.f32.mrf.mxu3 }
 0x31d   : > { %v923_v47 = vmax.f32 %v919_v43, %v2250_v7  ;;  %v929_v48 = vmax.f32 %v925_v44, %v2308_v45 }
 0x31f   : > { %v927_v51 = vmax.f32 %v923_v47, %v2277_v21  ;;  %v931_v53 = vmax.f32 %v928_v49, %v929_v48 }
 0x321   : > { %v930_v52 = vmax.f32 %v926_v50, %v927_v51 }
 0x323   : > { %v932_v54 = vmax.f32 %v930_v52, %v931_v53 }
 0x325   : > { %v933_v55 = vrot.slane %v932_v54, 4 }
 0x327   : > { %v934_v17 = vmax.f32 %v932_v54, %v933_v55 }
 0x329   : > { %v935_v18 = vrot.slane %v934_v17, 2 }
 0x32b   : > { %v936_v19 = vmax.f32 %v934_v17, %v935_v18 }
 0x32d   : > { %v937_v20 = vrot.slane %v936_v19, 1 }
 0x32f   : > { %v2316_v22 = vmax.f32 %v936_v19, %v937_v20 }
 0x331   : > { %v939_v23 = vsub.f32 %v2220_v56, %v2316_v22  ;;  %v940_v26 = vsub.f32 %v2224_v58, %v2316_v22  ;;  %v941_v27 = vsub.f32 %v2228_v60, %v2316_v22  ;;  %v942_v28 = vsub.f32 %v2232_v62, %v2316_v22 }
 0x332   : > { %v943_v31 = vsub.f32 %v2236_v0, %v2316_v22  ;;  %v944_v35 = vsub.f32 %v2240_v2, %v2316_v22  ;;  %v945_v58 = vsub.f32 %v2244_v4, %v2316_v22  ;;  %v946_v60 = vsub.f32 %v2248_v6, %v2316_v22 }
 0x333   : > { %v971_v29 = vmul.f32 1.442695, %v939_v23  ;;  %v973_v30 = vmul.f32 1.442695, %v940_v26  ;;  %v975_v34 = vmul.f32 1.442695, %v941_v27  ;;  %v947_v37 = vsub.f32 %v2252_v8, %v2316_v22 }
 0x334   : > { %v977_v56 = vmul.f32 1.442695, %v942_v28  ;;  %v979_v62 = vmul.f32 1.442695, %v943_v31  ;;  %v948_v0 = vsub.f32 %v2256_v10, %v2316_v22  ;;  %v981_v38 = vmul.f32 1.442695, %v944_v35 }
 0x335   : > { %1672 = vpow2.f32 %v971_v29  ;;  %v953_v2 = vsub.f32 %v2258_v11, %v2316_v22  ;;  %v983_v41 = vmul.f32 1.442695, %v945_v58  ;;  %v954_v6 = vsub.f32 %v2264_v14, %v2316_v22 }
 0x336   : > { %1674 = vpow2.f32 %v973_v30  ;;  %v985_v42 = vmul.f32 1.442695, %v946_v60  ;;  %v951_v8 = vsub.f32 %v2283_v25, %v2316_v22  ;;  %v987_v33 = vmul.f32 1.442695, %v947_v37 }
 0x337   : > { %1676 = vpow2.f32 %v975_v34  ;;  %v952_v11 = vsub.f32 %v2296_v36, %v2316_v22  ;;  %v989_v44 = vmul.f32 1.442695, %v948_v0  ;;  %v999_v46 = vmul.f32 1.442695, %v953_v2 }
 0x338   : > { %1678 = vpow2.f32 %v977_v56  ;;  %v949_v25 = vsub.f32 %v2262_v13, %v2316_v22  ;;  %v1001_v48 = vmul.f32 1.442695, %v954_v6  ;;  %v995_v49 = vmul.f32 1.442695, %v951_v8 }
 0x339   : > { %1680 = vpow2.f32 %v979_v62  ;;  %v950_v36 = vsub.f32 %v2268_v16, %v2316_v22  ;;  %v997_v52 = vmul.f32 1.442695, %v952_v11  ;;  %v965_v16 = vsub.f32 %v2254_v9, %v2316_v22 }
 0x33a   : > { %1682 = vpow2.f32 %v981_v38  ;;  %v991_v55 = vmul.f32 1.442695, %v949_v25  ;;  %v966_v27 = vsub.f32 %v2260_v12, %v2316_v22  ;;  %v955_v29 = vsub.f32 %v2281_v24, %v2316_v22 }
 0x33b   : > { %v2338_v39 = vpop.eup %1672  ;;  %1684 = vpow2.f32 %v983_v41  ;;  %v993_v19 = vmul.f32 1.442695, %v950_v36  ;;  %v956_v34 = vsub.f32 %v2301_v40, %v2316_v22  ;;  %v969_v35 = vsub.f32 %v2292_v32, %v2316_v22 }
 0x33c   : > { %v2342_v4 = vpop.eup %1674  ;;  %1686 = vpow2.f32 %v985_v42  ;;  %v1023_v56 = vmul.f32 1.442695, %v965_v16  ;;  %v970_v62 = vsub.f32 %v2308_v45, %v2316_v22  ;;  %v1025_v24 = vmul.f32 1.442695, %v966_v27 }
 0x33d   : > { %v1035_v10 = vadd.f32 %v2342_v4, %v2338_v39  ;;  %v2350_v43 = vpop.eup %1676  ;;  %1688 = vpow2.f32 %v987_v33  ;;  %v967_v37 = vsub.f32 %v2266_v15, %v2316_v22  ;;  %v1003_v0 = vmul.f32 1.442695, %v955_v29 }
 0x33e   : > { %v2355_v47 = vpop.eup %1678  ;;  %1690 = vpow2.f32 %v989_v44  ;;  %v968_v32 = vsub.f32 %v2277_v21, %v2316_v22  ;;  %v1005_v2 = vmul.f32 1.442695, %v956_v34  ;;  %v1031_v41 = vmul.f32 1.442695, %v969_v35 }
 0x33f   : > { %v1036_v14 = vadd.f32 %v2350_v43, %v1035_v10  ;;  %v2360_v51 = vpop.eup %1680  ;;  %1692 = vpow2.f32 %v999_v46  ;;  %v957_v45 = vsub.f32 %v2222_v57, %v2316_v22  ;;  %v1033_v33 = vmul.f32 1.442695, %v970_v62 }
 0x340   : > { %v2365_v54 = vpop.eup %1682  ;;  %1694 = vpow2.f32 %v1001_v48  ;;  %v1027_v15 = vmul.f32 1.442695, %v967_v37  ;;  %v958_v11 = vsub.f32 %v2226_v59, %v2316_v22  ;;  %v1029_v21 = vmul.f32 1.442695, %v968_v32  ;;  %v1501_v32 = vld [vmem:[#allocation4] sm:$0xf] }
 0x341   : > { %v1037_v50 = vadd.f32 %v2355_v47, %v1036_v14  ;;  %v2367_v13 = vpop.eup %1684  ;;  %1696 = vpow2.f32 %v995_v49  ;;  %v959_v44 = vsub.f32 %v2230_v61, %v2316_v22  ;;  %v960_v57 = vsub.f32 %v2234_v63, %v2316_v22 }
 0x342   : > { %v2370_v18 = vpop.eup %1686  ;;  %1698 = vpow2.f32 %v997_v52  ;;  %v1007_v25 = vmul.f32 1.442695, %v957_v45  ;;  %v963_v49 = vsub.f32 %v2246_v5, %v2316_v22  ;;  %v964_v61 = vsub.f32 %v2250_v7, %v2316_v22 }
 0x343   : > { %v1038_v53 = vadd.f32 %v2360_v51, %v1037_v50  ;;  %v2372_v20 = vpop.eup %1688  ;;  %1700 = vpow2.f32 %v991_v55  ;;  %v1009_v36 = vmul.f32 1.442695, %v958_v11  ;;  %v1011_v63 = vmul.f32 1.442695, %v959_v44 }
 0x344   : > { %v2377_v26 = vpop.eup %1690  ;;  %1702 = vpow2.f32 %v993_v19  ;;  %v961_v19 = vsub.f32 %v2238_v1, %v2316_v22  ;;  %v1013_v16 = vmul.f32 1.442695, %v960_v57  ;;  %v1083_v34 = vpack.c.bf16 %v2370_v18, %v2367_v13  ;;  %v1560_v57 = vld [vmem:[#allocation4 + $0x14] sm:$0xf0] }
 0x345   : > { %v1039_v17 = vadd.f32 %v2365_v54, %v1038_v53  ;;  %v1693_v28 = vpop.eup %1692  ;;  %1704 = vpow2.f32 %v1023_v56  ;;  %v1084_v5 = vpack.c.bf16 %v2377_v26, %v2372_v20 }
 0x346   : > { %v1695_v31 = vpop.eup %1694  ;;  %1706 = vpow2.f32 %v1025_v24 }
 0x347   : > { %v1040_v23 = vadd.f32 %v2367_v13, %v1039_v17  ;;  %v1697_v9 = vpop.eup %1696  ;;  %v1087_v12 = vpack.c.bf16 %v1695_v31, %v1693_v28  ;;  %1708 = vpow2.f32 %v1003_v0  ;;  %v1081_v0 = vpack.c.bf16 %v2355_v47, %v2350_v43 }
 0x348   : > { %v1699_v60 = vpop.eup %1698  ;;  %1710 = vpow2.f32 %v1005_v2  ;;  %v1558_v2 = vld [vmem:[#allocation4 + $0x4] sm:$0xf0] }
 0x349   : > { %v1041_v30 = vadd.f32 %v2370_v18, %v1040_v23  ;;  %1136 = vmatpush.bf16.msrb.mxu1 %v1087_v12  ;;  %v1701_v38 = vpop.eup %1700  ;;  %v1086_v42 = vpack.c.bf16 %v1699_v60, %v1697_v9  ;;  %1712 = vpow2.f32 %v1031_v41  ;;  %v1019_v23 = vmul.f32 1.442695, %v963_v49 }
 0x34a   : > { %v1703_v8 = vpop.eup %1702  ;;  %1714 = vpow2.f32 %v1033_v33  ;;  %v1082_v12 = vpack.c.bf16 %v2365_v54, %v2360_v51 }
 0x34b   : > { %v1042_v58 = vadd.f32 %v2372_v20, %v1041_v30  ;;  %v1085_v14 = vpack.c.bf16 %v1703_v8, %v1701_v38  ;;  %v2404_v48 = vpop.eup %1704  ;;  %1716 = vpow2.f32 %v1027_v15  ;;  %v1021_v30 = vmul.f32 1.442695, %v964_v61 }
 0x34c   : > { %v2408_v50 = vpop.eup %1706  ;;  %1718 = vpow2.f32 %v1029_v21 }
 0x34d   : > { %v1043_v40 = vadd.f32 %v2377_v26, %v1042_v58  ;;  %1137 = vmatpush.bf16.msrb.mxu1 %v1086_v42  ;;  %v2412_v52 = vpop.eup %1708  ;;  %v1093_v55 = vpack.c.bf16 %v2408_v50, %v2404_v48  ;;  %1720 = vpow2.f32 %v1007_v25 }
 0x34e   : > { %v2418_v17 = vpop.eup %1710  ;;  %1722 = vpow2.f32 %v1009_v36  ;;  %v1511_v36 = vld [vmem:[#allocation4 + $0x18] sm:$0xf0] }
 0x34f   : > { %v1044_v6 = vadd.f32 %v1701_v38, %v1043_v40  ;;  %v2422_v7 = vpop.eup %1712  ;;  %1724 = vpow2.f32 %v1011_v63  ;;  %v1088_v49 = vpack.c.bf16 %v2418_v17, %v2412_v52  ;;  %v1517_v63 = vld [vmem:[#allocation4 + $0x20] sm:$0xf] }
 0x350   : > { %v2424_v29 = vpop.eup %1714  ;;  %1726 = vpow2.f32 %v1013_v16  ;;  %v1519_v16 = vld [vmem:[#allocation4 + $0x28] sm:$0xf0] }
 0x351   : > { %v1045_v10 = vadd.f32 %v1703_v8, %v1044_v6  ;;  %1138 = vmatpush.bf16.msrb.mxu1 %v1085_v14  ;;  %v1717_v20 = vpop.eup %1716  ;;  %v1095_v1 = vpack.c.bf16 %v2424_v29, %v2422_v7  ;;  %1728 = vpow2.f32 %v1019_v23  ;;  %v1080_v6 = vpack.c.bf16 %v2342_v4, %v2338_v39  ;;  %v1503_v4 = vld [vmem:[#allocation4 + $0x8] sm:$0xf0]  ;;  %v1509_v14 = vld [vmem:[#allocation4 + $0x10] sm:$0xf]  ;;  %v1564_v23 = vld [vmem:[#allocation4 + $0x34] sm:$0xf0] }
 0x352   : > { %1730 = vpow2.f32 %v1021_v30  ;;  %v1502_v8 = vor.u32 %v1558_v2, %v1501_v32  ;;  %v1510_v61 = vor.u32 %v1560_v57, %v1509_v14  ;;  %v1208_v32 = vld [vmem:[%s2060_s21] sm:$0xff]  ;;  %v1211_v57 = vld [vmem:[%s2060_s21 + $0x18] sm:$0xff] }
 0x353   : > { %v1046_v46 = vadd.f32 %v1697_v9, %v1045_v10  ;;  %v1719_v9 = vpop.eup %1718  ;;  %1165 = vmatpush.bf16.msra.mxu2 %v1095_v1 }
 0x354   : > { %v1094_v58 = vpack.c.bf16 %v1719_v9, %v1717_v20 }
 0x355   : > { %v1047_v59 = vadd.f32 %v1699_v60, %v1046_v46  ;;  %1139 = vmatpush.bf16.msrb.mxu1 %v1084_v5  ;;  %v1557_v46 = vld [vmem:[#allocation4 + $0x4] sm:$0xf] }
 0x357   : > { %v1048_v53 = vadd.f32 %v1693_v28, %v1047_v59  ;;  %v962_v28 = vsub.f32 %v2242_v3, %v2316_v22  ;;  %v1721_v3 = vpop.eup %1720  ;;  %1166 = vmatpush.bf16.msra.mxu2 %v1094_v58  ;;  %v1506_v59 = vor.u32 %v1557_v46, %v1503_v4 }
 0x358   : > { %v1723_v60 = vpop.eup %1722 }
 0x359   : > { %v1049_v27 = vadd.f32 %v1695_v31, %v1048_v53  ;;  %v1015_v31 = vmul.f32 1.442695, %v961_v19  ;;  %1140 = vmatpush.bf16.msrb.mxu1 %v1083_v34  ;;  %v1017_v22 = vmul.f32 1.442695, %v962_v28  ;;  %v1725_v62 = vpop.eup %1724  ;;  %v1089_v44 = vpack.c.bf16 %v1723_v60, %v1721_v3  ;;  %v1562_v53 = vld [vmem:[#allocation4 + $0x24] sm:$0xf0] }
 0x35a   : > { %v1727_v18 = vpop.eup %1726  ;;  %v1518_v5 = vor.u32 %v1562_v53, %v1517_v63  ;;  %v1561_v19 = vld [vmem:[#allocation4 + $0x24] sm:$0xf] }
 0x35b   : > { %v1050_v26 = vadd.f32 %v2412_v52, %v1049_v27  ;;  %1732 = vpow2.f32 %v1015_v31  ;;  %v1729_v24 = vpop.eup %1728  ;;  %1167 = vmatpush.bf16.msra.mxu2 %v1093_v55  ;;  %v1090_v10 = vpack.c.bf16 %v1727_v18, %v1725_v62  ;;  %v1522_v52 = vor.u32 %v1561_v19, %v1519_v16  ;;  %v1563_v27 = vld [vmem:[#allocation4 + $0x34] sm:$0xf]  ;;  %v1213_v16 = vld [vmem:[%s2060_s21 + $0x28] sm:$0xff] }
 0x35c   : > { %1734 = vpow2.f32 %v1017_v22  ;;  %v1731_v40 = vpop.eup %1730 }
 0x35d   : > { %v1051_v35 = vadd.f32 %v2418_v17, %v1050_v26  ;;  %1141 = vmatpush.bf16.msrb.mxu1 %v1082_v12  ;;  %v1092_v41 = vpack.c.bf16 %v1731_v40, %v1729_v24 }
 0x35f   : > { %v1052_v56 = vadd.f32 %v1721_v3, %v1051_v35  ;;  %1168 = vmatpush.bf16.msra.mxu2 %v1092_v41 }
 0x361   : > { %v1053_v13 = vadd.f32 %v1723_v60, %v1052_v56  ;;  %1142 = vmatpush.bf16.msrb.mxu1 %v1081_v0  ;;  %v1733_v51 = vpop.eup %1732 }
 0x362   : > { %v1735_v42 = vpop.eup %1734 }
 0x363   : > { %v1054_v37 = vadd.f32 %v1725_v62, %v1053_v13  ;;  %v1091_v15 = vpack.c.bf16 %v1735_v42, %v1733_v51 }
 0x365   : > { %v1055_v38 = vadd.f32 %v1727_v18, %v1054_v37  ;;  %1143 = vmatpush.bf16.msrb.mxu1 %v1080_v6  ;;  %1169 = vmatpush.bf16.msra.mxu2 %v1091_v15 }
 0x367   : > { %v1056_v54 = vadd.f32 %v1733_v51, %v1055_v38 }
 0x368   : > { %1144 = vmatmul.bf16.vlgmr.msrb.gmra.mxu1 %v1502_v8  ;;  %v1209_v8 = vld [vmem:[%s2060_s21 + $0x8] sm:$0xff] }
 0x369   : > { %v1057_v45 = vadd.f32 %v1735_v42, %v1056_v54  ;;  %1170 = vmatpush.bf16.msra.mxu2 %v1090_v10 }
 0x36b   : > { %v1058_v33 = vadd.f32 %v1729_v24, %v1057_v45 }
 0x36d   : > { %v1059_v43 = vadd.f32 %v1731_v40, %v1058_v33  ;;  %1171 = vmatpush.bf16.msra.mxu2 %v1089_v44  ;;  %v2446_v40 = vstv %s1216_s24 }
 0x36f   : > { %v1060_v47 = vadd.f32 %v2404_v48, %v1059_v43 }
 0x371   : > { %v1061_v11 = vadd.f32 %v2408_v50, %v1060_v47  ;;  %1172 = vmatpush.bf16.msra.mxu2 %v1088_v49  ;;  %v1559_v50 = vld [vmem:[#allocation4 + $0x14] sm:$0xf] }
 0x372   : > { %v1514_v55 = vor.u32 %v1559_v50, %v1511_v36  ;;  %v1212_v50 = vld [vmem:[%s2060_s21 + $0x20] sm:$0xff] }
 0x373   : > { %v1062_v21 = vadd.f32 %v1717_v20, %v1061_v11  ;;  %v1210_v11 = vld [vmem:[%s2060_s21 + $0x10] sm:$0xff] }
 0x374   : > { %1173 = vmatmul.bf16.vlgmr.msra.gmra.mxu2 %v1506_v59 }
 0x375   : > { %v1063_v39 = vadd.f32 %v1719_v9, %v1062_v21 }
 0x377   : > { %v1064_v25 = vadd.f32 %v2422_v7, %v1063_v39  ;;  %v1525_v7 = vld [vmem:[#allocation4 + $0x30] sm:$0xf] }
 0x378   : > { %1149 = vmatmul.bf16.gmra.mxu1 %v1510_v61  ;;  %v1526_v17 = vor.u32 %v1564_v23, %v1525_v7 }
 0x379   : > { %v1065_v48 = vadd.f32 %v2424_v29, %v1064_v25  ;;  %v1527_v29 = vld [vmem:[#allocation4 + $0x38] sm:$0xf0] }
 0x37a   : > { %v1530_v28 = vor.u32 %v1563_v27, %v1527_v29 }
 0x37b   : > { %v1066_v30 = vrot.slane %v1065_v48, 4 }
 0x37d   : > { %v1067_v20 = vadd.f32 %v1066_v30, %v1065_v48 }
 0x37f   : > { %v1068_v26 = vrot.slane %v1067_v20, 2 }
 0x381   : > { %v1069_v1 = vadd.f32 %v1068_v26, %v1067_v20 }
 0x383   : > { %v1070_v34 = vrot.slane %v1069_v1, 1 }
 0x384   : > { %1178 = vmatmul.bf16.gmra.mxu2 %v1514_v55 }
 0x385   : > { %v1071_v9 = vadd.f32 %v1070_v34, %v1069_v1 }
 0x387   : > { %1736 = vrcp.f32 %v1071_v9  ;;  %v1205_v12 = vand.u32 2147483648, %v1071_v9  ;;  %vm1199_vm5 = vweird.f32 %v1071_v9  ;;  %v1203_v62 = vand.u32 2147483647, %v1071_v9 }
 0x388   : > { %1154 = vmatmul.bf16.gmra.mxu1 %v1518_v5 }
 0x389   : > { %v1206_v24 = vor.u32 1.1754944e-38, %v1205_v12  ;;  %vm1204_vm7 = vcmp.eq.f32.partialorder %v1203_v62, 8.507059e+37 }
 0x38d   : > { %v1737_v31 = vpop.eup %1736 }
 0x38e   : > { %v1195_v35 = vmul.f32 %v1737_v31, %v1071_v9  ;;  %vm1200_vm4 = vweird.f32 %v1737_v31 }
 0x38f   : > { %vm1201_vm6 = vmor %vm1199_vm5, %vm1200_vm4 }
 0x390   : > { %v1196_v22 = vsub.f32 1.0, %v1195_v35 }
 0x392   : > { %v1197_v56 = vmul.f32 %v1737_v31, %v1196_v22 }
 0x394   : > { %1183 = vmatmul.bf16.gmra.mxu2 %v1522_v52  ;;  %v1198_v58 = vadd.f32 %v1737_v31, %v1197_v56 }
 0x396   : > { %v1202_v13 = vsel %vm1201_vm6, %v1737_v31, %v1198_v58  ;;  %v1215_v31 = vld [vmem:[%s2060_s21 + $0x38] sm:$0xff] }
 0x397   : > { %v1207_v0 = vsel %vm1204_vm7, %v1206_v24, %v1202_v13 }
 0x398   : > { %1159 = vmatmul.bf16.gmra.mxu1 %v1526_v17 }
 0x3a4   : > { %1188 = vmatmul.bf16.gmra.mxu2 %v1530_v28  ;;  %v1214_v28 = vld [vmem:[%s2060_s21 + $0x30] sm:$0xff] }
 0x3e5   : > { %v1145_v3 = vpop.f32.mrf.mxu1 }
 0x3ed   : > { %v1147_v60 = vpop.f32.mrf.mxu1 }
 0x3f5   : > { %v1150_v51 = vpop.f32.mrf.mxu1 }
 0x3f7   : > { %v1174_v18 = vpop.f32.mrf.mxu2 }
 0x3f8   : > { %v1175_v37 = vadd.f32 %v1174_v18, %v1145_v3 }
 0x3fa   : > { %v1217_v38 = vmul.f32 %v1207_v0, %v1175_v37 }
 0x3fc   : > { %v1226_v2 = vmul.f32 %v2446_v40, %v1217_v38 }
 0x3fd   : > { %v1152_v43 = vpop.f32.mrf.mxu1 }
 0x3fe   : > { %v1234_v54 = vadd.f32 %v1226_v2, %v1208_v32 }
 0x3ff   : > { %v1176_v41 = vpop.f32.mrf.mxu2 }
 0x400   : > { %1242 = vst [vmem:[%s2066_s13] sm:$0xff] %v1234_v54  ;;  %v1177_v6 = vadd.f32 %v1176_v41, %v1147_v60 }
 0x402   : > { %v1218_v42 = vmul.f32 %v1207_v0, %v1177_v6 }
 0x404   : > { %v1227_v45 = vmul.f32 %v2446_v40, %v1218_v42 }
 0x405   : > { %v1155_v4 = vpop.f32.mrf.mxu1 }
 0x406   : > { %v1235_v33 = vadd.f32 %v1227_v45, %v1209_v8 }
 0x407   : > { %v1179_v15 = vpop.f32.mrf.mxu2 }
 0x408   : > { %1243 = vst [vmem:[%s2066_s13 + $0x8] sm:$0xff] %v1235_v33  ;;  %v1180_v47 = vadd.f32 %v1179_v15, %v1150_v51 }
 0x40a   : > { %v1219_v10 = vmul.f32 %v1207_v0, %v1180_v47 }
 0x40c   : > { %v1228_v21 = vmul.f32 %v2446_v40, %v1219_v10 }
 0x40d   : > { %v1157_v36 = vpop.f32.mrf.mxu1 }
 0x40e   : > { %v1236_v44 = vadd.f32 %v1228_v21, %v1210_v11 }
 0x40f   : > { %v1181_v46 = vpop.f32.mrf.mxu2 }
 0x410   : > { %1244 = vst [vmem:[%s2066_s13 + $0x10] sm:$0xff] %v1236_v44  ;;  %v1182_v39 = vadd.f32 %v1181_v46, %v1152_v43 }
 0x412   : > { %v1220_v14 = vmul.f32 %v1207_v0, %v1182_v39 }
 0x414   : > { %v1229_v25 = vmul.f32 %v2446_v40, %v1220_v14 }
 0x415   : > { %v1160_v23 = vpop.f32.mrf.mxu1 }
 0x416   : > { %v1237_v49 = vadd.f32 %v1229_v25, %v1211_v57 }
 0x417   : > { %v1184_v59 = vpop.f32.mrf.mxu2 }
 0x418   : > { %1245 = vst [vmem:[%s2066_s13 + $0x18] sm:$0xff] %v1237_v49  ;;  %v1185_v61 = vadd.f32 %v1184_v59, %v1155_v4 }
 0x41a   : > { %v1221_v48 = vmul.f32 %v1207_v0, %v1185_v61 }
 0x41c   : > { %v1230_v63 = vmul.f32 %v2446_v40, %v1221_v48 }
 0x41d   : > { %v1162_v26 = vpop.f32.mrf.mxu1 }
 0x41e   : > { %v1238_v53 = vadd.f32 %v1230_v63, %v1212_v50 }
 0x41f   : > { %v1186_v55 = vpop.f32.mrf.mxu2 }
 0x420   : > { %1246 = vst [vmem:[%s2066_s13 + $0x20] sm:$0xff] %v1238_v53  ;;  %v1187_v5 = vadd.f32 %v1186_v55, %v1157_v36 }
 0x422   : > { %v1222_v19 = vmul.f32 %v1207_v0, %v1187_v5 }
 0x424   : > { %v1231_v7 = vmul.f32 %v2446_v40, %v1222_v19 }
 0x426   : > { %v1239_v52 = vadd.f32 %v1231_v7, %v1213_v16 }
 0x427   : > { %v1189_v17 = vpop.f32.mrf.mxu2 }
 0x428   : > { %1247 = vst [vmem:[%s2066_s13 + $0x28] sm:$0xff] %v1239_v52  ;;  %v1190_v27 = vadd.f32 %v1189_v17, %v1160_v23 }
 0x42a   : > { %v1223_v29 = vmul.f32 %v1207_v0, %v1190_v27 }
 0x42c   : > { %v1232_v30 = vmul.f32 %v2446_v40, %v1223_v29 }
 0x42e   : > { %v1240_v20 = vadd.f32 %v1232_v30, %v1214_v28 }
 0x42f   : > { %v1191_v1 = vpop.f32.mrf.mxu2 }
 0x430   : > { %1248 = vst [vmem:[%s2066_s13 + $0x30] sm:$0xff] %v1240_v20  ;;  %v1192_v34 = vadd.f32 %v1191_v1, %v1162_v26 }
 0x432   : > { %v1224_v9 = vmul.f32 %v1207_v0, %v1192_v34 }
 0x434   : > { %v1233_v35 = vmul.f32 %v2446_v40, %v1224_v9 }
 0x436   : > { %v1241_v3 = vadd.f32 %v1233_v35, %v1215_v31 }
 0x438   : > { %1249 = vst [vmem:[%s2066_s13 + $0x38] sm:$0xff] %v1241_v3 }
 0x439   : > { %1819 = shalt.err (!%p1816_p5)
}
 0x43a   : > { %s1910_s9 = smov 128   ;;  %s1911_s13 = smov 256  }
 0x43b   : > { %s1912_s24 = smov 8  }
 0x43c   : > { %1573 = dma.vmem_to_hbm [thread:$0]  (%p2031_p9), %s1265_s25, 1024, %s1267_s14, %s1251_s23, %s1910_s9, %s1911_s13, %s1912_s24  }
 0x43d PF: > { %s2558_s30 = sld [smem:[#allocation16_spill]]  ;;  %p1584_p6 = scmp.ge.s32.totalorder %s1896_s18, 2 }
 0x43f   : > { %p1580_p7 = pnand %p1584_p6, %p2037_p12 }
 0x441   : > { %p1581_p8 = pneg %p1580_p7 }
 0x443   : > { %s1281_s0 = sand.u32 1, %s2558_s30  }
 0x444   : > { %s1282_s19 = scalar_lea.sflag [#allocation10], %s1281_s0 }
 0x445   : > { %1863 = dma.done.wait (%p1581_p8), %s1282_s19, 1024  }
 0x446   : > { %1865 = vsyncadd (%p1581_p8), %s1282_s19, 4294966272  ;;  %s26_s18 = sadd.s32 1, %s1896_s18   ;;  %s2560_s1 = sld [smem:[#allocation17_spill]] }
 0x447   : > { %p23_p10 = scmp.ge.s32.totalorder %s26_s18, 6   ;;  %s2561_s13 = sld [smem:[#allocation24_spill]] }
 0x448   : > { %s2562_s14 = sld [smem:[#allocation18_spill]]  ;;  %s2566_s11 = smov %s1872_s12 }
 0x449   : > { %s2563_s15 = sld [smem:[#allocation19_spill]]  ;;  %25 = sbr.rel (!%p23_p10) target bundleno = 11 (0xb), region = 124 }
 0x44a   : > { %s2564_s16 = sld [smem:[#allocation20_spill]] }
 0x44b   : > { %s2565_s17 = sld [smem:[#allocation21_spill]] }
 0x44c   : > { %s2567_s12 = smov %s2560_s1 }
 0x44e   :  { %1288 = vsyncpa [#allocation9], 1 }
 0x44f   :  { %1290 = vsyncpa [#allocation9 + $0x1], 1 }
 0x450   :  { %1291 = vsyncpa [#allocation10], 1 }
 0x451   :  { %1293 = vsyncpa [#allocation10 + $0x1], 1 }
 0x452   :  { %1294 = vsyncmov [#allocation6] }
 0x455   :  { %s1295_s25 = vpop.sfrf %1294 }
 0x456   :  { %p1536_p9 = scmp.ne.s32.totalorder %s1295_s25, 0 }
 0x458   :  { %1299 = shalt.err (%p1536_p9)  }

</bundles_post_ra>
